<compile_context>
chip_gen: v7x
topology: tpu7x:2x2x1
jax: 0.10.0
libtpu: 0.0.40
codegen_flags: <defaults>
</compile_context>

<pallas_src>
import functools
import math

import jax
import jax.numpy as jnp
from jax.experimental import pallas as pl
from jax.experimental.pallas import tpu as pltpu


# ----------------------------------------------------------------------------
# tiling helpers
# ----------------------------------------------------------------------------

def _pick_tile(dim, target, unit):
    """Largest tile <= target that divides dim and is a multiple of `unit`.

    Used for model dims (N / K / S) which are either small (<= target, where a
    full-dim block is always legal) or nice multiples of 128.
    """
    if dim <= target:
        return dim
    t = (target // unit) * unit
    while t >= unit:
        if dim % t == 0:
            return t
        t -= unit
    return dim


def _row_plan(M, target):
    """Row (token) tiling: return (tile, padded_M) with padded_M % tile == 0.

    Never falls back to a full-dim block for large M: pads instead, so VMEM
    per grid step stays bounded on v7x.
    """
    if M <= target:
        return M, M
    t = (target // 8) * 8
    while t >= 8:
        if M % t == 0:
            return t, M
        t -= 8
    t = (target // 8) * 8
    return t, ((M + t - 1) // t) * t


def _pad_rows(a, Mp):
    M = a.shape[0]
    if Mp == M:
        return a
    return jnp.pad(a, ((0, Mp - M),) + ((0, 0),) * (a.ndim - 1))


# Row tile targets: 512 for N-tiled matmuls, 256 where N stays untiled
# (f32 (tm, N) accumulator) so v7x's 32 MiB scoped VMEM default is enough —
# no vmem_limit_bytes override required at these tile sizes.
_TM, _TN, _TK = 512, 512, 512
_TM_FUSED = 256


# ----------------------------------------------------------------------------
# kernel: tiled matmul + bias (+ optional GELU)
# ----------------------------------------------------------------------------

def _mm_kernel(x_ref, w_ref, b_ref, o_ref, acc_ref, *, activation, n_k):
    k = pl.program_id(2)

    @pl.when(k == 0)
    def _():
        acc_ref[...] = jnp.zeros_like(acc_ref)

    acc_ref[...] += jnp.dot(x_ref[...], w_ref[...],
                            preferred_element_type=jnp.float32)

    @pl.when(k == n_k - 1)
    def _():
        y = acc_ref[...] + b_ref[...].astype(jnp.float32)
        if activation == "gelu":
            # TODO(synk): tanh-approx GELU; HF BERT default is exact erf GELU
            # (~1e-3 activation difference).
            c = math.sqrt(2.0 / math.pi)
            y = 0.5 * y * (1.0 + jnp.tanh(c * (y + 0.044715 * y * y * y)))
        o_ref[...] = y.astype(o_ref.dtype)


def matmul_bias(x, w, b, activation=None, out_dtype=None):
    """y = act(x @ w + b), tiled over (M, N, K).  x/w bf16, b f32."""
    M, K = x.shape
    N = w.shape[1]
    out_dtype = out_dtype or x.dtype
    tm, Mp = _row_plan(M, _TM)
    tn = _pick_tile(N, _TN, 128)
    tk = _pick_tile(K, _TK, 128)
    x = _pad_rows(x, Mp)
    nm, nn, nk = Mp // tm, N // tn, K // tk
    out = pl.pallas_call(
        functools.partial(_mm_kernel, activation=activation, n_k=nk),
        out_shape=jax.ShapeDtypeStruct((Mp, N), out_dtype),
        grid=(nm, nn, nk),
        in_specs=[pl.BlockSpec((tm, tk), lambda i, j, k: (i, k)),
                  # TODO(synk): pipeline_mode=pl.Buffered(3) on this weight
                  # block would further hide DMA latency on v5e; left at the
                  # default double-buffer depth.
                  pl.BlockSpec((tk, tn), lambda i, j, k: (k, j)),
                  pl.BlockSpec((1, tn), lambda i, j, k: (0, j))],
        out_specs=pl.BlockSpec((tm, tn), lambda i, j, k: (i, j)),
        scratch_shapes=[pltpu.VMEM((tm, tn), jnp.float32)],
        compiler_params=pltpu.CompilerParams(
            dimension_semantics=("parallel", "parallel", "arbitrary")),
    )(x, w, b.reshape(1, N))
    return out[:M] if Mp != M else out


# ----------------------------------------------------------------------------
# kernel: fused QKV projection with three separate outputs (no XLA split)
# ----------------------------------------------------------------------------

def _qkv_kernel(x_ref, w_ref, b_ref, oq_ref, ok_ref, ov_ref, acc_ref,
                *, n_k, hidden):
    k = pl.program_id(1)

    @pl.when(k == 0)
    def _():
        acc_ref[...] = jnp.zeros_like(acc_ref)

    acc_ref[...] += jnp.dot(x_ref[...], w_ref[...],
                            preferred_element_type=jnp.float32)

    @pl.when(k == n_k - 1)
    def _():
        y = acc_ref[...] + b_ref[...].astype(jnp.float32)
        oq_ref[...] = y[:, :hidden].astype(oq_ref.dtype)
        ok_ref[...] = y[:, hidden:2 * hidden].astype(ok_ref.dtype)
        ov_ref[...] = y[:, 2 * hidden:].astype(ov_ref.dtype)


def qkv_proj(x, wqkv, bqkv, hidden):
    """x @ [wq|wk|wv] + b -> (q, k, v) each [M, hidden] (bf16)."""
    M, K = x.shape
    N = wqkv.shape[1]                       # 3 * hidden
    tm, Mp = _row_plan(M, _TM_FUSED)
    tk = _pick_tile(K, _TK, 128)
    x = _pad_rows(x, Mp)
    nm, nk = Mp // tm, K // tk
    outs = pl.pallas_call(
        functools.partial(_qkv_kernel, n_k=nk, hidden=hidden),
        out_shape=(jax.ShapeDtypeStruct((Mp, hidden), x.dtype),) * 3,
        grid=(nm, nk),
        in_specs=[pl.BlockSpec((tm, tk), lambda i, k: (i, k)),
                  pl.BlockSpec((tk, N), lambda i, k: (k, 0)),
                  pl.BlockSpec((1, N), lambda i, k: (0, 0))],
        out_specs=(pl.BlockSpec((tm, hidden), lambda i, k: (i, 0)),) * 3,
        scratch_shapes=[pltpu.VMEM((tm, N), jnp.float32)],
        compiler_params=pltpu.CompilerParams(
            dimension_semantics=("parallel", "arbitrary")),
    )(x, wqkv, bqkv.reshape(1, N))
    if Mp != M:
        outs = tuple(o[:M] for o in outs)
    return outs


# ----------------------------------------------------------------------------
# kernel: tiled matmul + bias + residual add + LayerNorm (fused epilogue)
# ----------------------------------------------------------------------------

def _mm_res_ln_kernel(x_ref, w_ref, b_ref, r_ref, g_ref, bln_ref,
                      o_ref, acc_ref, *, n_k, eps):
    k = pl.program_id(1)

    @pl.when(k == 0)
    def _():
        acc_ref[...] = jnp.zeros_like(acc_ref)

    acc_ref[...] += jnp.dot(x_ref[...], w_ref[...],
                            preferred_element_type=jnp.float32)

    @pl.when(k == n_k - 1)
    def _():
        h = (acc_ref[...] + b_ref[...].astype(jnp.float32)
             + r_ref[...].astype(jnp.float32))
        mean = jnp.mean(h, axis=-1, keepdims=True)
        var = jnp.mean(jnp.square(h - mean), axis=-1, keepdims=True)
        y = (h - mean) * jax.lax.rsqrt(var + eps)
        o_ref[...] = (y * g_ref[...] + bln_ref[...]).astype(o_ref.dtype)


def matmul_bias_res_ln(x, w, b, residual, gamma, beta, eps=1e-12,
                       out_dtype=None):
    """LayerNorm(residual + x @ w + b); N (full hidden) untiled for the LN."""
    M, K = x.shape
    N = w.shape[1]
    out_dtype = out_dtype or residual.dtype
    tm, Mp = _row_plan(M, _TM_FUSED)
    tk = _pick_tile(K, _TK, 128)
    x = _pad_rows(x, Mp)
    residual = _pad_rows(residual, Mp)
    nm, nk = Mp // tm, K // tk
    out = pl.pallas_call(
        functools.partial(_mm_res_ln_kernel, n_k=nk, eps=eps),
        out_shape=jax.ShapeDtypeStruct((Mp, N), out_dtype),
        grid=(nm, nk),
        in_specs=[pl.BlockSpec((tm, tk), lambda i, k: (i, k)),
                  pl.BlockSpec((tk, N), lambda i, k: (k, 0)),
                  pl.BlockSpec((1, N), lambda i, k: (0, 0)),
                  pl.BlockSpec((tm, N), lambda i, k: (i, 0)),
                  pl.BlockSpec((1, N), lambda i, k: (0, 0)),
                  pl.BlockSpec((1, N), lambda i, k: (0, 0))],
        out_specs=pl.BlockSpec((tm, N), lambda i, k: (i, 0)),
        scratch_shapes=[pltpu.VMEM((tm, N), jnp.float32)],
        compiler_params=pltpu.CompilerParams(
            dimension_semantics=("parallel", "arbitrary")),
    )(x, w, b.reshape(1, N), residual, gamma, beta)
    return out[:M] if Mp != M else out


# ----------------------------------------------------------------------------
# kernel: pure LayerNorm (embedding LN; no zero-residual DMA)
# ----------------------------------------------------------------------------

def _ln_kernel(x_ref, g_ref, b_ref, o_ref, *, eps):
    h = x_ref[...].astype(jnp.float32)
    mean = jnp.mean(h, axis=-1, keepdims=True)
    var = jnp.mean(jnp.square(h - mean), axis=-1, keepdims=True)
    y = (h - mean) * jax.lax.rsqrt(var + eps)
    o_ref[...] = (y * g_ref[...] + b_ref[...]).astype(o_ref.dtype)


def layernorm(x, g, b, eps=1e-12, out_dtype=None):
    M, H = x.shape
    out_dtype = out_dtype or x.dtype
    tm, Mp = _row_plan(M, 512)
    x = _pad_rows(x, Mp)
    out = pl.pallas_call(
        functools.partial(_ln_kernel, eps=eps),
        out_shape=jax.ShapeDtypeStruct((Mp, H), out_dtype),
        grid=(Mp // tm,),
        in_specs=[pl.BlockSpec((tm, H), lambda i: (i, 0)),
                  pl.BlockSpec((1, H), lambda i: (0, 0)),
                  pl.BlockSpec((1, H), lambda i: (0, 0))],
        out_specs=pl.BlockSpec((tm, H), lambda i: (i, 0)),
        compiler_params=pltpu.CompilerParams(
            dimension_semantics=("parallel",)),
    )(x, g, b)
    return out[:M] if Mp != M else out


# ----------------------------------------------------------------------------
# kernel: attention — grid (batch, q-tile), heads looped in-kernel,
# lane-dense (tq, H) output row slab (no head split/merge transposes outside).
# ----------------------------------------------------------------------------

def _attn_kernel(q_ref, k_ref, v_ref, m_ref, o_ref, *, n_heads, head_dim):
    q = q_ref[0]                                   # [tq, H] bf16 (scale folded into Wq)
    k = k_ref[0]                                   # [S,  H] bf16
    v = v_ref[0]                                   # [S,  H] bf16
    m = m_ref[0].astype(jnp.float32)               # [1, S] additive mask
    ctx_heads = []
    for h in range(n_heads):                       # static; nH is small
        lo, hi = h * head_dim, (h + 1) * head_dim
        qh, kh, vh = q[:, lo:hi], k[:, lo:hi], v[:, lo:hi]
        # contract on head_dim directly (no in-kernel transpose of K)
        s = jnp.einsum("qd,kd->qk", qh, kh,
                       preferred_element_type=jnp.float32) + m
        s = s - jnp.max(s, axis=-1, keepdims=True)
        p = jnp.exp(s)
        p = p * pl.reciprocal(jnp.sum(p, axis=-1, keepdims=True), approx=True)
        ctx_heads.append(jnp.dot(p.astype(vh.dtype), vh,
                                 preferred_element_type=jnp.float32))
    o_ref[0] = jnp.concatenate(ctx_heads, axis=-1).astype(o_ref.dtype)


def attention(q, k, v, mask_add, n_heads):
    """q/k/v: [B, S, H] bf16 (head-interleaved on lanes); mask_add: [B,1,S] f32."""
    B, S, H = q.shape
    Dh = H // n_heads
    tq = _pick_tile(S, 256, 8)
    nq = S // tq
    # TODO(synk): for very long sequences add a KV inner loop (flash-style
    # online softmax) so the per-head (tq, S) score tile stays VMEM-bounded.
    return pl.pallas_call(
        functools.partial(_attn_kernel, n_heads=n_heads, head_dim=Dh),
        out_shape=jax.ShapeDtypeStruct((B, S, H), q.dtype),
        grid=(B, nq),
        in_specs=[pl.BlockSpec((1, tq, H), lambda b, qi: (b, qi, 0)),
                  pl.BlockSpec((1, S, H), lambda b, qi: (b, 0, 0)),
                  pl.BlockSpec((1, S, H), lambda b, qi: (b, 0, 0)),
                  pl.BlockSpec((1, 1, S), lambda b, qi: (b, 0, 0))],
        out_specs=pl.BlockSpec((1, tq, H), lambda b, qi: (b, qi, 0)),
        compiler_params=pltpu.CompilerParams(
            dimension_semantics=("parallel", "parallel")),
    )(q, k, v, mask_add)


# ----------------------------------------------------------------------------
# kernel: token-level cross-entropy (tiled over tokens, padded-class masking)
# ----------------------------------------------------------------------------

def _xent_kernel(logits_ref, labels_ref, o_ref, sum_ref, cnt_ref,
                 *, c_actual, n_m):
    i = pl.program_id(0)

    @pl.when(i == 0)
    def _():
        sum_ref[...] = jnp.zeros_like(sum_ref)
        cnt_ref[...] = jnp.zeros_like(cnt_ref)

    logits = logits_ref[...].astype(jnp.float32)      # [tm, Cp]
    labels = labels_ref[...]                          # [tm, 1] int32
    tm, cp = logits.shape
    col = jax.lax.broadcasted_iota(jnp.int32, (tm, cp), 1)
    lg = jnp.where(col < c_actual, logits, jnp.float32(-1e30))
    m = jnp.max(lg, axis=-1, keepdims=True)
    lse = jnp.log(jnp.sum(jnp.exp(lg - m), axis=-1, keepdims=True)) + m
    picked = jnp.sum(jnp.where(col == labels, lg, 0.0), axis=-1, keepdims=True)
    valid = (labels >= 0).astype(jnp.float32)         # ignore negative labels
    per_row = (lse - picked) * valid
    sum_ref[...] += jnp.sum(per_row, keepdims=True)
    cnt_ref[...] += jnp.sum(valid, keepdims=True)

    @pl.when(i == n_m - 1)
    def _():
        o_ref[...] = sum_ref[...] / jnp.maximum(cnt_ref[...], 1.0)


def cross_entropy(logits_padded, labels, num_classes):
    """Mean CE over tokens with labels >= 0; padded class columns masked."""
    T, Cp = logits_padded.shape
    tm, Tp = _row_plan(T, 256)
    labels = labels.astype(jnp.int32)
    if Tp != T:
        logits_padded = jnp.pad(logits_padded, ((0, Tp - T), (0, 0)))
        labels = jnp.pad(labels, ((0, Tp - T),), constant_values=-1)
    nm = Tp // tm
    labels2d = labels.reshape(Tp, 1)
    # TODO(synk): running sum/count could live in SMEM scalars and labels ride
    # via scalar-prefetch; deferred (loss path is tiny vs the encoder).
    out = pl.pallas_call(
        functools.partial(_xent_kernel, c_actual=num_classes, n_m=nm),
        out_shape=jax.ShapeDtypeStruct((1, 1), jnp.float32),
        grid=(nm,),
        in_specs=[pl.BlockSpec((tm, Cp), lambda i: (i, 0)),
                  pl.BlockSpec((tm, 1), lambda i: (i, 0))],
        out_specs=pl.BlockSpec((1, 1), lambda i: (0, 0)),
        scratch_shapes=[pltpu.VMEM((1, 1), jnp.float32),
                        pltpu.VMEM((1, 1), jnp.float32)],
        compiler_params=pltpu.CompilerParams(
            dimension_semantics=("arbitrary",)),
    )(logits_padded, labels2d)
    return out[0, 0]


# ----------------------------------------------------------------------------
# Parameters (deterministic synthetic init; shapes follow BertModel + classifier)
# ----------------------------------------------------------------------------

_CLS_PAD = 128   # lane-dense classifier output width


def init_params(key, vocab_size=50, max_pos=32, type_vocab=2,
                hidden=32, heads=2, intermediate=64, num_layers=2,
                num_labels=4):
    def nrm(k, shape):
        return 0.02 * jax.random.normal(k, shape, dtype=jnp.float32)

    q_scale = 1.0 / math.sqrt(hidden // heads)   # folded into Wq (and bq if nonzero)

    keys = jax.random.split(key, 4 + num_layers)
    cls_w = jnp.zeros((hidden, _CLS_PAD), jnp.float32)
    cls_w = cls_w.at[:, :num_labels].set(nrm(keys[3], (hidden, num_labels)))
    params = dict(
        config=dict(hidden=hidden, heads=heads, num_labels=num_labels),
        word_emb=nrm(keys[0], (vocab_size, hidden)),
        pos_emb=nrm(keys[1], (max_pos, hidden)),
        type_emb=nrm(keys[2], (type_vocab, hidden)),
        emb_ln_g=jnp.ones((1, hidden), jnp.float32),
        emb_ln_b=jnp.zeros((1, hidden), jnp.float32),
        # SingleLinearClassifier(hidden_size, num_labels), padded to 128 lanes
        cls_w=cls_w.astype(jnp.bfloat16),
        cls_b=jnp.zeros((_CLS_PAD,), jnp.float32),
        layers=[],
    )
    for l in range(num_layers):
        lk = jax.random.split(keys[4 + l], 6)
        wq = nrm(lk[0], (hidden, hidden)) * q_scale   # attention scale pre-folded
        wk = nrm(lk[1], (hidden, hidden))
        wv = nrm(lk[2], (hidden, hidden))
        params["layers"].append(dict(
            # fused QKV: [H, 3H] (order q | k | v); q bias is zero so no scaling needed
            wqkv=jnp.concatenate([wq, wk, wv], axis=1).astype(jnp.bfloat16),
            bqkv=jnp.zeros((3 * hidden,), jnp.float32),
            wo=nrm(lk[3], (hidden, hidden)).astype(jnp.bfloat16),
            bo=jnp.zeros((hidden,), jnp.float32),
            ln1_g=jnp.ones((1, hidden), jnp.float32),
            ln1_b=jnp.zeros((1, hidden), jnp.float32),
            w1=nrm(lk[4], (hidden, intermediate)).astype(jnp.bfloat16),
            b1=jnp.zeros((intermediate,), jnp.float32),
            w2=nrm(lk[5], (intermediate, hidden)).astype(jnp.bfloat16),
            b2=jnp.zeros((hidden,), jnp.float32),
            ln2_g=jnp.ones((1, hidden), jnp.float32),
            ln2_b=jnp.zeros((1, hidden), jnp.float32),
        ))
    return params


# ----------------------------------------------------------------------------
# BertTagger.forward
# ----------------------------------------------------------------------------

def bert_tagger_forward(params, input_ids, token_type_ids=None,
                        attention_mask=None, labels=None, input_mask=None):
    # NOTE: the reference BertTagger also ignores input_mask in the loss
    # (both branches call the same CrossEntropyLoss on all tokens).
    cfg = params["config"]
    B, S = input_ids.shape
    H, nH, num_labels = cfg["hidden"], cfg["heads"], cfg["num_labels"]
    T = B * S

    if token_type_ids is None:
        token_type_ids = jnp.zeros_like(input_ids)
    if attention_mask is None:
        attention_mask = jnp.ones_like(input_ids)

    # ---- embeddings -------------------------------------------------------
    # TODO(synk): embedding gather kept in plain JAX (no clean rectangular BlockSpec).
    emb = (params["word_emb"][input_ids]
           + params["pos_emb"][jnp.arange(S)][None, :, :]
           + params["type_emb"][token_type_ids])                  # [B,S,H] f32
    x = layernorm(emb.reshape(T, H), params["emb_ln_g"], params["emb_ln_b"],
                  out_dtype=jnp.bfloat16)                         # [T,H] bf16

    # extended attention mask: (1 - mask) * -10000, per batch, broadcast in-kernel
    mask_add = ((1.0 - attention_mask.astype(jnp.float32))
                * -10000.0).reshape(B, 1, S)

    # ---- transformer encoder layers ---------------------------------------
    for layer in params["layers"]:
        q2d, k2d, v2d = qkv_proj(x, layer["wqkv"], layer["bqkv"], H)   # 3x [T,H] bf16
        ctx = attention(q2d.reshape(B, S, H), k2d.reshape(B, S, H),
                        v2d.reshape(B, S, H), mask_add, nH)            # [B,S,H] bf16
        x = matmul_bias_res_ln(ctx.reshape(T, H), layer["wo"], layer["bo"], x,
                               layer["ln1_g"], layer["ln1_b"])          # fused add+LN
        h = matmul_bias(x, layer["w1"], layer["b1"], activation="gelu")
        x = matmul_bias_res_ln(h, layer["w2"], layer["b2"], x,
                               layer["ln2_g"], layer["ln2_b"])

    # last_bert_layer.view(-1, hidden_size) is already [B*S, H].
    # nn.Dropout -> identity at inference.
    logits_padded = matmul_bias(x, params["cls_w"], params["cls_b"],
                                out_dtype=jnp.float32)            # [T, 128] f32

    if labels is not None:
        return cross_entropy(logits_padded, labels.reshape(-1), num_labels)
    return logits_padded[:, :num_labels]


# ----------------------------------------------------------------------------

if __name__ == "__main__":
    key = jax.random.PRNGKey(0)
    pkey, ikey, lkey = jax.random.split(key, 3)

    B, S, num_labels = 2, 8, 4
    params = init_params(pkey, num_labels=num_labels)

    input_ids = jax.random.randint(ikey, (B, S), 0, 50, dtype=jnp.int32)
    token_type_ids = jnp.zeros((B, S), jnp.int32)
    attention_mask = jnp.ones((B, S), jnp.int32).at[:, -2:].set(0)   # pad last 2 tokens
    labels = jax.random.randint(lkey, (B, S), 0, num_labels, dtype=jnp.int32)

    logits = bert_tagger_forward(params, input_ids, token_type_ids, attention_mask)
    logits = jax.block_until_ready(logits)
    assert logits.shape == (B * S, num_labels)
    assert jnp.all(jnp.isfinite(logits))

    loss = bert_tagger_forward(params, input_ids, token_type_ids, attention_mask,
                               labels=labels)
    loss = jax.block_until_ready(loss)
    assert jnp.isfinite(loss)

    print("KERNEL_OK")
</pallas_src>

<mosaic_0001>
module attributes {stable_mosaic.version = 11 : i64} {
  func.func @_ln_kernel(%arg0: i32, %arg1: memref<16x32xf32, #tpu.memory_space<vmem>>, %arg2: memref<1x32xf32, #tpu.memory_space<vmem>>, %arg3: memref<1x32xf32, #tpu.memory_space<vmem>>, %arg4: memref<16x32xbf16, #tpu.memory_space<vmem>>) attributes {dimension_semantics = [#tpu.dimension_semantics<parallel>], iteration_bounds = array<i64: 1>, scalar_prefetch = 0 : i64, scratch_operands = 0 : i64, tpu.core_type = #tpu.core_type<tc>, window_params = [{transform_indices = @transform_0, window_bounds = array<i64: 16, 32>}, {pipeline_mode = #tpu.pipeline_mode<synchronous>, transform_indices = @transform_1, window_bounds = array<i64: 1, 32>}, {pipeline_mode = #tpu.pipeline_mode<synchronous>, transform_indices = @transform_2, window_bounds = array<i64: 1, 32>}, {transform_indices = @transform_3, window_bounds = array<i64: 16, 32>}]} {
    %c0 = arith.constant 0 : index
    %c0_0 = arith.constant 0 : index
    %0 = vector.load %arg1[%c0, %c0_0] : memref<16x32xf32, #tpu.memory_space<vmem>>, vector<16x32xf32>
    %cst = arith.constant dense<0.000000e+00> : vector<16xf32>
    %1 = vector.multi_reduction <add>, %0, %cst [1] : vector<16x32xf32> to vector<16xf32>
    %2 = vector.shape_cast %1 : vector<16xf32> to vector<16x1xf32>
    %cst_1 = arith.constant 3.200000e+01 : f32
    %3 = vector.broadcast %cst_1 : f32 to vector<16x1xf32>
    %4 = arith.divf %2, %3 : vector<16x1xf32>
    %5 = vector.broadcast %4 : vector<16x1xf32> to vector<16x32xf32>
    %6 = arith.subf %0, %5 : vector<16x32xf32>
    %7 = arith.mulf %6, %6 : vector<16x32xf32>
    %cst_2 = arith.constant dense<0.000000e+00> : vector<16xf32>
    %8 = vector.multi_reduction <add>, %7, %cst_2 [1] : vector<16x32xf32> to vector<16xf32>
    %9 = vector.shape_cast %8 : vector<16xf32> to vector<16x1xf32>
    %cst_3 = arith.constant 3.200000e+01 : f32
    %10 = vector.broadcast %cst_3 : f32 to vector<16x1xf32>
    %11 = arith.divf %9, %10 : vector<16x1xf32>
    %12 = vector.broadcast %4 : vector<16x1xf32> to vector<16x32xf32>
    %13 = arith.subf %0, %12 : vector<16x32xf32>
    %cst_4 = arith.constant 9.99999996E-13 : f32
    %14 = vector.broadcast %cst_4 : f32 to vector<16x1xf32>
    %15 = arith.addf %11, %14 : vector<16x1xf32>
    %16 = math.rsqrt %15 : vector<16x1xf32>
    %17 = vector.broadcast %16 : vector<16x1xf32> to vector<16x32xf32>
    %18 = arith.mulf %13, %17 : vector<16x32xf32>
    %c0_5 = arith.constant 0 : index
    %c0_6 = arith.constant 0 : index
    %19 = vector.load %arg2[%c0_5, %c0_6] : memref<1x32xf32, #tpu.memory_space<vmem>>, vector<1x32xf32>
    %20 = vector.broadcast %19 : vector<1x32xf32> to vector<16x32xf32>
    %21 = arith.mulf %18, %20 : vector<16x32xf32>
    %c0_7 = arith.constant 0 : index
    %c0_8 = arith.constant 0 : index
    %22 = vector.load %arg3[%c0_7, %c0_8] : memref<1x32xf32, #tpu.memory_space<vmem>>, vector<1x32xf32>
    %23 = vector.broadcast %22 : vector<1x32xf32> to vector<16x32xf32>
    %24 = arith.addf %21, %23 : vector<16x32xf32>
    %25 = arith.truncf %24 : vector<16x32xf32> to vector<16x32xbf16>
    %c0_9 = arith.constant 0 : index
    %c0_10 = arith.constant 0 : index
    %26 = vector.load %arg4[%c0_9, %c0_10] : memref<16x32xbf16, #tpu.memory_space<vmem>>, vector<16x32xbf16>
    tpu.vector_store %arg4[%c0_9, %c0_10], %25 {strides = array<i32>} : memref<16x32xbf16, #tpu.memory_space<vmem>>, vector<16x32xbf16>,
    return
  }
  func.func @transform_0(%arg0: i32) -> (i32, i32) {
    %c0_i32 = arith.constant 0 : i32
    %c0_i32_0 = arith.constant 0 : i32
    return %arg0, %c0_i32 : i32, i32
  }
  func.func @transform_1(%arg0: i32) -> (i32, i32) {
    %c0_i32 = arith.constant 0 : i32
    %c0_i32_0 = arith.constant 0 : i32
    %c0_i32_1 = arith.constant 0 : i32
    return %c0_i32, %c0_i32_0 : i32, i32
  }
  func.func @transform_2(%arg0: i32) -> (i32, i32) {
    %c0_i32 = arith.constant 0 : i32
    %c0_i32_0 = arith.constant 0 : i32
    %c0_i32_1 = arith.constant 0 : i32
    return %c0_i32, %c0_i32_0 : i32, i32
  }
  func.func @transform_3(%arg0: i32) -> (i32, i32) {
    %c0_i32 = arith.constant 0 : i32
    %c0_i32_0 = arith.constant 0 : i32
    return %arg0, %c0_i32 : i32, i32
  }
}

</mosaic_0001>

<bundles_post_ra>
// kernel: tpu_custom_call.1
= control target key start
LH: loop header
LB: loop body
LE: loop exit
PB: predicated region body
PF: predicated region fallthrough
CT: control target
= control target key end

     0   :  { %8 = vsyncpa [#allocation3], 0  ;;  %s229_s0 = inlined_call_operand.hbm [shape: f32[16,32], index: 0, kind: input, shape index: {}]   ;;  %s230_s1 = inlined_call_operand.vmem [shape: f32[1,32], index: 1, kind: input, shape index: {}]   ;;  %s231_s2 = inlined_call_operand.vmem [shape: f32[1,32], index: 2, kind: input, shape index: {}]   ;;  %s232_s3 = inlined_call_operand.hbm [shape: bf16[16,32], index: 3, kind: output, shape index: {}]  }
   0x1   :  { %9 = vsyncpa [#allocation4], 0  ;;  %s169_s12 = smov [#allocation2]   ;;  %s121_s16 = scalar_lea.hbm %s229_s0, 256 }
   0x2   :  { %s15_s13 = sshll.u32 %s169_s12, 4  ;;  %p122_p0 = scmp.ne.s32.totalorder %s229_s0, %s121_s16  ;;  %s16_s13 = int_to_ptr.vmem [resolvable:$true] %s15_s13 }
   0x3   :  { %p125_p1 = scmp.lt.u32.totalorder %s121_s16, %s229_s0 }
   0x5   :  { %p127_p2 = pnand %p125_p1, %p122_p0 }
   0x7   :  { %130 = shalt.err (!%p127_p2)
}
   0x8   :  { %s131_s21 = scalar_lea.vmem %s16_s13, 256  ;;  %p136_p4 = scmp.lt.s32.totalorder %s16_s13, %s16_s13 }
   0x9   :  { %p132_p3 = scmp.ne.s32.totalorder %s16_s13, %s131_s21  ;;  %p137_p5 = scmp.lt.s32.totalorder %s131_s21, %s131_s21 }
   0xb   :  { %p138_p6 = por %p137_p5, %p136_p4 }
   0xd   :  { %p139_p7 = pnand %p138_p6, %p132_p3 }
   0xf   :  { %142 = shalt.err (!%p139_p7)
}
  0x10   :  { %s170_s22 = smov 128   ;;  %s171_s23 = smov 8  }
  0x11   :  { %21 = dma.hbm_to_vmem [thread:$0]  %s229_s0, 256, %s16_s13, [#allocation3], %s170_s22, %s170_s22, %s171_s23  }
  0x12   :  { %165 = dma.done.wait [#allocation3], 256  }
  0x13   :  { %166 = vsyncadd [#allocation3], 4294967040  ;;  %vm31_vm0 = vcmask 261120   ;;  %v29_v0 = vld [vmem:[#allocation2] sm:$0xff]  ;;  %v30_v1 = vld [vmem:[#allocation2 + $0x8] sm:$0xff]  ;;  %vm85_vm1 = vcmask 257024  }
  0x14   :  { %v32_v2 = vsel %vm31_vm0, %v29_v0, 0.0  ;;  %v35_v3 = vsel %vm31_vm0, %v30_v1, 0.0  ;;  %v105_v21 = vld [vmem:[%s230_s1] ss:$0 sm:$0xff]  ;;  %s172_s29 = smov [#allocation5]  }
  0x15   :  { %33 = vadd.xlane.f32.xlu0 %v32_v2  ;;  %v106_v23 = vld [vmem:[%s231_s2] ss:$0 sm:$0xff]  ;;  %s93_s30 = sshll.u32 %s172_s29, 4  ;;  %s94_s30 = int_to_ptr.vmem [resolvable:$true] %s93_s30 }
  0x16   :  { %s143_s1 = scalar_lea.vmem %s94_s30, 128  ;;  %p148_p9 = scmp.lt.s32.totalorder %s94_s30, %s94_s30 }
  0x17   :  { %p144_p8 = scmp.ne.s32.totalorder %s94_s30, %s143_s1  ;;  %p149_p10 = scmp.lt.s32.totalorder %s143_s1, %s143_s1 }
  0x19   :  { %36 = vadd.xlane.f32.xlu0 %v35_v3  ;;  %p150_p11 = por %p149_p10, %p148_p9 }
  0x1b   :  { %p151_p12 = pnand %p150_p11, %p144_p8 }
  0xa2   :  { %v34_v4 = vpop.xlane.xlu0 %33 }
  0xa3   :  { %v39_v5 = vmul.f32 0.03125, %v34_v4 }
  0xa5   :  { %v41_v6 = vsub.f32 %v29_v0, %v39_v5 }
  0xa6   :  { %v37_v7 = vpop.xlane.xlu0 %36 }
  0xa7   :  { %v40_v8 = vmul.f32 0.03125, %v37_v7  ;;  %v43_v9 = vmul.f32 %v41_v6, %v41_v6 }
  0xa9   :  { %v42_v10 = vsub.f32 %v30_v1, %v40_v8  ;;  %v45_v11 = vsel %vm31_vm0, %v43_v9, 0.0 }
  0xaa   :  { %46 = vadd.xlane.f32.xlu1 %v45_v11 }
  0xab   :  { %v44_v12 = vmul.f32 %v42_v10, %v42_v10 }
  0xad   :  { %v48_v13 = vsel %vm31_vm0, %v44_v12, 0.0 }
  0xae   :  { %49 = vadd.xlane.f32.xlu1 %v48_v13 }
 0x137   :  { %v47_v14 = vpop.xlane.xlu1 %46 }
 0x138   :  { %v51_v15 = vmul.f32 0.03125, %v47_v14 }
 0x13a   :  { %v53_v16 = vadd.f32 1e-12, %v51_v15 }
 0x13b   :  { %v50_v17 = vpop.xlane.xlu1 %49 }
 0x13c   :  { %117 = vrsqrt.f32 %v53_v16  ;;  %v52_v18 = vmul.f32 0.03125, %v50_v17 }
 0x13e   :  { %v54_v19 = vadd.f32 1e-12, %v52_v18 }
 0x140   :  { %119 = vrsqrt.f32 %v54_v19 }
 0x146   :  { %v118_v20 = vpop.eup %117 }
 0x147   :  { %v57_v22 = vmul.f32 %v118_v20, %v41_v6 }
 0x149   :  { %v66_v24 = vmul.f32 %v105_v21, %v57_v22 }
 0x14a   :  { %v120_v25 = vpop.eup %119 }
 0x14b   :  { %v58_v26 = vmul.f32 %v120_v25, %v42_v10  ;;  %v75_v27 = vadd.f32 %v106_v23, %v66_v24 }
 0x14d   :  { %v67_v28 = vmul.f32 %v105_v21, %v58_v26  ;;  %v109_v29 = vpack.c.bf16 %v75_v27, %v75_v27 }
 0x14f   :  { %v76_v30 = vadd.f32 %v106_v23, %v67_v28  ;;  %86 = vst.msk [vmem:[#allocation5] sm:$0xf] %vm85_vm1, %v109_v29 }
 0x151   :  { %v110_v31 = vpack.c.bf16 %v76_v30, %v76_v30 }
 0x153   :  { %87 = vst.msk [vmem:[#allocation5 + $0x4] sm:$0xf] %vm85_vm1, %v110_v31 }
 0x154   :  { %154 = shalt.err (!%p151_p12)
}
 0x155   :  { %s155_s5 = scalar_lea.hbm %s232_s3, 128 }
 0x156   :  { %p156_p13 = scmp.ne.s32.totalorder %s232_s3, %s155_s5  ;;  %p159_p0 = scmp.lt.u32.totalorder %s155_s5, %s232_s3 }
 0x158   :  { %p161_p1 = pnand %p159_p0, %p156_p13 }
 0x15a   :  { %164 = shalt.err (!%p161_p1)
}
 0x15b   :  { %s173_s10 = smov 64   ;;  %s174_s11 = smov 4  }
 0x15c   :  { %99 = dma.vmem_to_hbm [thread:$0]  %s94_s30, 128, %s232_s3, [#allocation4], %s173_s10, %s173_s10, %s174_s11  }
 0x15d   :  { %167 = dma.done.wait [#allocation4], 128  }
 0x15e   :  { %168 = vsyncadd [#allocation4], 4294967168 }
 0x15f   :  { %103 = vsyncpa [#allocation3], 1 }
 0x160   :  { %104 = vsyncpa [#allocation4], 1 }

</bundles_post_ra>
